<compile_context>
chip_gen: v6e
topology: v6e:2x2x1
jax: 0.10.0
libtpu: 0.0.40
codegen_flags: <defaults>
</compile_context>

<pallas_src>
import jax
import jax.numpy as jnp
from jax.experimental import pallas as pl
from jax.experimental.pallas import tpu as pltpu

LANE = 128
SUBLANE = 8
DEFAULT_TILE = 8192  # batch (lane) tile; [tb,13] f32 block lane-pads to tb*512 B/buffer


def _round_up(n, m):
    return ((n + m - 1) // m) * m


def mlp_kernel(x_ref, w1_ref, b1_ref, w2_ref, b2_ref, o_ref):
    # Layouts inside the kernel:
    #   x:  [tb, 13]  (native row-major batch tile, streamed straight from HBM)
    #   w1: [6, 13]   b1: [6, 1]   w2: [6, 1]   b2: [1, 1] (SMEM)
    #   o:  [1, tb]   (batch on lanes -> lane-dense output store)
    x_t = x_ref[...].T            # [13, tb] — XLU relayout, batch onto lanes
    w1 = w1_ref[...]
    b1 = b1_ref[...]
    w2 = w2_ref[...]
    b2 = b2_ref[0, 0]

    # Linear(13 -> 6) + Tanh: one MXU matmul over the lane-dense batch tile.
    h = jnp.tanh(jnp.dot(w1, x_t, preferred_element_type=jnp.float32) + b1)   # [6, tb]

    # Linear(6 -> 1): K=6, N=1 would waste the MXU -> VPU multiply + sublane reduce.
    y = jnp.sum(h * w2, axis=0, keepdims=True) + b2                            # [1, tb]

    # LeakyReLU(negative_slope=0.01) — PyTorch default.
    o_ref[...] = jnp.where(y >= 0.0, y, 0.01 * y)


def housing_mlp_forward(x, w1, b1, w2, b2, *, tile=DEFAULT_TILE):
    """x: [B, 13]; w1: [6, 13]; b1: [6]; w2: [1, 6]; b2: [1]  ->  [B, 1]."""
    B, in_features = x.shape
    hid = w1.shape[0]

    x = x.astype(jnp.float32)

    # Lane-aligned batch tile; NO padding / transposing of x on the wrapper side.
    # Pallas handles the ragged final block (masked load of x rows, masked store
    # of the out-of-range output columns).
    tb = min(_round_up(tile, LANE), _round_up(B, LANE))
    grid = (pl.cdiv(B, tb),)

    b1_col = b1.reshape(hid, 1).astype(jnp.float32)
    w2_col = w2.reshape(hid, 1).astype(jnp.float32)   # [1, 6] -> [6, 1] column
    b2_sc = b2.reshape(1, 1).astype(jnp.float32)

    # Double-buffered x blocks (13 lanes pad to 128) + double-buffered output
    # blocks (1 sublane pads to 8) + headroom for in-kernel intermediates/weights.
    vmem_limit = 2 * tb * LANE * 4 + 2 * SUBLANE * tb * 4 + (12 << 20)

    cost = pl.CostEstimate(
        flops=B * (2 * in_features * hid + 2 * hid),
        transcendentals=B * hid,
        bytes_accessed=B * (in_features + 1) * 4
        + (hid * in_features + 2 * hid + 1) * 4,
    )

    const = lambda shape: pl.BlockSpec(shape, lambda i: (0, 0))

    out = pl.pallas_call(
        mlp_kernel,
        out_shape=jax.ShapeDtypeStruct((1, B), jnp.float32),
        grid=grid,
        in_specs=[
            pl.BlockSpec((tb, in_features), lambda i: (i, 0)),   # x tile (pipelined)
            const((hid, in_features)),                           # w1, VMEM-resident
            const((hid, 1)),                                     # b1, VMEM-resident
            const((hid, 1)),                                     # w2 column, resident
            pl.BlockSpec(memory_space=pltpu.MemorySpace.SMEM),   # b2 scalar
        ],
        out_specs=pl.BlockSpec((1, tb), lambda i: (0, i)),
        compiler_params=pltpu.CompilerParams(
            dimension_semantics=("parallel",),
            vmem_limit_bytes=vmem_limit,
        ),
        cost_estimate=cost,
    )(x, w1.astype(jnp.float32), b1_col, w2_col, b2_sc)

    return out[0, :].reshape(B, 1)


def reference_forward(x, w1, b1, w2, b2):
    h = jnp.tanh(x @ w1.T + b1)
    y = h @ w2.T + b2
    return jnp.where(y >= 0.0, y, 0.01 * y)


if __name__ == "__main__":
    key = jax.random.PRNGKey(0)
    k_x, k_w1, k_b1, k_w2, k_b2 = jax.random.split(key, 5)

    B = 8  # small batch
    IN, HID, OUT = 13, 6, 1

    x = jax.random.normal(k_x, (B, IN), dtype=jnp.float32)

    # Deterministic PyTorch-style uniform init: U(-1/sqrt(fan_in), 1/sqrt(fan_in))
    lim1 = 1.0 / jnp.sqrt(jnp.float32(IN))
    lim2 = 1.0 / jnp.sqrt(jnp.float32(HID))
    w1 = jax.random.uniform(k_w1, (HID, IN), jnp.float32, -lim1, lim1)
    b1 = jax.random.uniform(k_b1, (HID,), jnp.float32, -lim1, lim1)
    w2 = jax.random.uniform(k_w2, (OUT, HID), jnp.float32, -lim2, lim2)
    b2 = jax.random.uniform(k_b2, (OUT,), jnp.float32, -lim2, lim2)

    out = housing_mlp_forward(x, w1, b1, w2, b2)
    out = jax.block_until_ready(out)

    ref = reference_forward(x, w1, b1, w2, b2)
    assert out.shape == (B, 1)
    assert jnp.allclose(out, ref, atol=1e-5, rtol=1e-5)

    # Exercise the multi-tile grid + ragged-final-block path with a larger batch
    # that is not a multiple of the tile (300 = 2*128 + 44).
    B2 = 300
    x2 = jax.random.normal(k_x, (B2, IN), dtype=jnp.float32)
    out2 = jax.block_until_ready(housing_mlp_forward(x2, w1, b1, w2, b2, tile=128))
    ref2 = reference_forward(x2, w1, b1, w2, b2)
    assert out2.shape == (B2, 1)
    assert jnp.allclose(out2, ref2, atol=1e-5, rtol=1e-5)

    # Default (large) tile path as well.
    out3 = jax.block_until_ready(housing_mlp_forward(x2, w1, b1, w2, b2))
    assert jnp.allclose(out3, ref2, atol=1e-5, rtol=1e-5)

    print("KERNEL_OK")
</pallas_src>

<mosaic_0001>
module attributes {stable_mosaic.version = 11 : i64} {
  func.func @mlp_kernel(%arg0: i32, %arg1: memref<128x13xf32, #tpu.memory_space<vmem>>, %arg2: memref<6x13xf32, #tpu.memory_space<vmem>>, %arg3: memref<6x1xf32, #tpu.memory_space<vmem>>, %arg4: memref<6x1xf32, #tpu.memory_space<vmem>>, %arg5: memref<1x1xf32, #tpu.memory_space<smem>>, %arg6: memref<1x128xf32, #tpu.memory_space<vmem>>) attributes {dimension_semantics = [#tpu.dimension_semantics<parallel>], iteration_bounds = array<i64: 1>, scalar_prefetch = 0 : i64, scratch_operands = 0 : i64, tpu.core_type = #tpu.core_type<tc>, window_params = [{transform_indices = @transform_0, window_bounds = array<i64: 128, 13>}, {pipeline_mode = #tpu.pipeline_mode<synchronous>, transform_indices = @transform_1, window_bounds = array<i64: 6, 13>}, {pipeline_mode = #tpu.pipeline_mode<synchronous>, transform_indices = @transform_2, window_bounds = array<i64: 6, 1>}, {pipeline_mode = #tpu.pipeline_mode<synchronous>, transform_indices = @transform_3, window_bounds = array<i64: 6, 1>}, {transform_indices = @transform_4, window_bounds = array<i64: 1, 1>}, {transform_indices = @transform_5, window_bounds = array<i64: 1, 128>}]} {
    %c0 = arith.constant 0 : index
    %c0_0 = arith.constant 0 : index
    %0 = vector.load %arg1[%c0, %c0_0] : memref<128x13xf32, #tpu.memory_space<vmem>>, vector<128x13xf32>
    %1 = tpu.transpose %0, [1, 0] : vector<128x13xf32> -> vector<13x128xf32>
    %c0_1 = arith.constant 0 : index
    %c0_2 = arith.constant 0 : index
    %2 = vector.load %arg2[%c0_1, %c0_2] : memref<6x13xf32, #tpu.memory_space<vmem>>, vector<6x13xf32>
    %c0_3 = arith.constant 0 : index
    %c0_4 = arith.constant 0 : index
    %3 = vector.load %arg3[%c0_3, %c0_4] : memref<6x1xf32, #tpu.memory_space<vmem>>, vector<6x1xf32>
    %c0_5 = arith.constant 0 : index
    %c0_6 = arith.constant 0 : index
    %4 = vector.load %arg4[%c0_5, %c0_6] : memref<6x1xf32, #tpu.memory_space<vmem>>, vector<6x1xf32>
    %c0_7 = arith.constant 0 : index
    %c0_8 = arith.constant 0 : index
    %5 = memref.load %arg5[%c0_7, %c0_8] : memref<1x1xf32, #tpu.memory_space<smem>>
    %cst = arith.constant dense<0.000000e+00> : vector<6x128xf32>
    %6 = tpu.matmul %2, %1, %cst {dimension_numbers = #tpu.dot_dimension_numbers<[1], [0], [0], [1], [0, 0, 1, 1], [], []>} : vector<6x13xf32>, vector<13x128xf32>, vector<6x128xf32> -> vector<6x128xf32>
    %7 = vector.broadcast %3 : vector<6x1xf32> to vector<6x128xf32>
    %8 = arith.addf %6, %7 : vector<6x128xf32>
    %9 = math.tanh %8 : vector<6x128xf32>
    %10 = vector.broadcast %4 : vector<6x1xf32> to vector<6x128xf32>
    %11 = arith.mulf %9, %10 : vector<6x128xf32>
    %cst_9 = arith.constant dense<0.000000e+00> : vector<128xf32>
    %12 = vector.multi_reduction <add>, %11, %cst_9 [0] : vector<6x128xf32> to vector<128xf32>
    %13 = vector.shape_cast %12 : vector<128xf32> to vector<1x128xf32>
    %14 = vector.broadcast %5 : f32 to vector<1x128xf32>
    %15 = arith.addf %13, %14 : vector<1x128xf32>
    %cst_10 = arith.constant 0.000000e+00 : f32
    %16 = vector.broadcast %cst_10 : f32 to vector<1x128xf32>
    %17 = arith.cmpf oge, %15, %16 : vector<1x128xf32>
    %cst_11 = arith.constant 0.00999999977 : f32
    %18 = vector.broadcast %cst_11 : f32 to vector<1x128xf32>
    %19 = arith.mulf %18, %15 : vector<1x128xf32>
    %20 = arith.select %17, %15, %19 : vector<1x128xi1>, vector<1x128xf32>
    %c0_12 = arith.constant 0 : index
    %c0_13 = arith.constant 0 : index
    %21 = vector.load %arg6[%c0_12, %c0_13] : memref<1x128xf32, #tpu.memory_space<vmem>>, vector<1x128xf32>
    tpu.vector_store %arg6[%c0_12, %c0_13], %20 {strides = array<i32>} : memref<1x128xf32, #tpu.memory_space<vmem>>, vector<1x128xf32>,
    return
  }
  func.func @transform_0(%arg0: i32) -> (i32, i32) {
    %c0_i32 = arith.constant 0 : i32
    %c0_i32_0 = arith.constant 0 : i32
    return %arg0, %c0_i32 : i32, i32
  }
  func.func @transform_1(%arg0: i32) -> (i32, i32) {
    %c0_i32 = arith.constant 0 : i32
    %c0_i32_0 = arith.constant 0 : i32
    %c0_i32_1 = arith.constant 0 : i32
    return %c0_i32, %c0_i32_0 : i32, i32
  }
  func.func @transform_2(%arg0: i32) -> (i32, i32) {
    %c0_i32 = arith.constant 0 : i32
    %c0_i32_0 = arith.constant 0 : i32
    %c0_i32_1 = arith.constant 0 : i32
    return %c0_i32, %c0_i32_0 : i32, i32
  }
  func.func @transform_3(%arg0: i32) -> (i32, i32) {
    %c0_i32 = arith.constant 0 : i32
    %c0_i32_0 = arith.constant 0 : i32
    %c0_i32_1 = arith.constant 0 : i32
    return %c0_i32, %c0_i32_0 : i32, i32
  }
  func.func @transform_4(%arg0: i32) -> (i32, i32) {
    %c0_i32 = arith.constant 0 : i32
    %c0_i32_0 = arith.constant 0 : i32
    %c0_i32_1 = arith.constant 0 : i32
    return %c0_i32, %c0_i32_0 : i32, i32
  }
  func.func @transform_5(%arg0: i32) -> (i32, i32) {
    %c0_i32 = arith.constant 0 : i32
    %c0_i32_0 = arith.constant 0 : i32
    return %c0_i32, %arg0 : i32, i32
  }
}

</mosaic_0001>

<bundles_post_ra>
// kernel: tpu_custom_call.1
= control target key start
LH: loop header
LB: loop body
LE: loop exit
PB: predicated region body
PF: predicated region fallthrough
CT: control target
= control target key end

     0   :  { %vm47_vm0 = vcmask 105472   ;;  %v302_v1 = vmov 0.0   ;;  %vm303_vm1 = vmmov 0   ;;  %v304_v2 = vmov 0   ;;  %s416_s0 = inlined_call_operand.vmem [shape: f32[8,13], index: 0, kind: input, shape index: {}]   ;;  %s417_s1 = inlined_call_operand.vmem [shape: f32[6,13], index: 1, kind: input, shape index: {}]   ;;  %s418_s2 = inlined_call_operand.vmem [shape: f32[6,1], index: 2, kind: input, shape index: {}]   ;;  %s419_s3 = inlined_call_operand.vmem [shape: f32[6,1], index: 3, kind: input, shape index: {}]   ;;  %s420_s4 = inlined_call_operand.<no memory space> [shape: f32[1,1], index: 4, kind: input, shape index: {}]   ;;  %s421_s5 = inlined_call_operand.hbm [shape: f32[1,8], index: 5, kind: output, shape index: {}]  }
   0x1   :  { %v37_v0 = vld [vmem:[%s416_s0 + $0x78] sm:$0xff]  ;;  %238 = vmatprep.subr.mxu0 %v302_v1  ;;  %270 = vmatprep.mubr.msk.f32.mxu0 %vm303_vm1, %v302_v1  ;;  %v36_v3 = vld [vmem:[%s416_s0 + $0x70] sm:$0xff]  ;;  %v39_v4 = vld [vmem:[%s418_s2] sm:$0x3f] }
   0x2   :  { %239 = vmatpush3.xpose.msk.msra.mxu0 %vm47_vm0, %v37_v0  ;;  %277 = vset.pattern.permute.xlu0 %v304_v2 }
   0x3   :  { %240 = vmatprep.subr.mxu0 %v302_v1  ;;  %44 = vperm.xlu0 %277, %v39_v4  }
   0x6   :  { %241 = vmatpush3.xpose.msk.msra.mxu0 %vm47_vm0, %v36_v3 }
   0x7   :  { %11 = vsyncpa [#allocation4], 0  ;;  %242 = vmatprep.subr.mxu0 %v302_v1  ;;  %v35_v5 = vld [vmem:[%s416_s0 + $0x68] sm:$0xff]  ;;  %v40_v6 = vld [vmem:[%s419_s3] sm:$0x3f]  ;;  %vm176_vm2 = vcmask 1045504   ;;  %v184_v34 = vstv %s420_s4 }
   0x8   :  { %172 = vperm.xlu0 %277, %v40_v6   ;;  %v34_v7 = vld [vmem:[%s416_s0 + $0x60] sm:$0xff]  ;;  %v33_v8 = vld [vmem:[%s416_s0 + $0x58] sm:$0xff]  ;;  %v32_v9 = vld [vmem:[%s416_s0 + $0x50] sm:$0xff] }
   0x9   :  { %v31_v10 = vld [vmem:[%s416_s0 + $0x48] sm:$0xff]  ;;  %v30_v11 = vld [vmem:[%s416_s0 + $0x40] sm:$0xff]  ;;  %v29_v12 = vld [vmem:[%s416_s0 + $0x38] sm:$0xff] }
   0xa   :  { %243 = vmatpush3.xpose.msk.msra.mxu0 %vm47_vm0, %v35_v5  ;;  %v28_v13 = vld [vmem:[%s416_s0 + $0x30] sm:$0xff]  ;;  %v27_v14 = vld [vmem:[%s416_s0 + $0x28] sm:$0xff]  ;;  %v26_v15 = vld [vmem:[%s416_s0 + $0x20] sm:$0xff] }
   0xb   :  { %244 = vmatprep.subr.mxu0 %v302_v1  ;;  %v25_v16 = vld [vmem:[%s416_s0 + $0x18] sm:$0xff]  ;;  %v24_v17 = vld [vmem:[%s416_s0 + $0x10] sm:$0xff]  ;;  %v23_v18 = vld [vmem:[%s416_s0 + $0x8] sm:$0xff] }
   0xc   :  { %v22_v19 = vld [vmem:[%s416_s0] sm:$0xff] }
   0xd   :  { %v38_v20 = vld [vmem:[%s417_s1] sm:$0x3f]  ;;  %s305_s1 = smov [#allocation3]  }
   0xe   :  { %245 = vmatpush3.xpose.msk.msra.mxu0 %vm47_vm0, %v34_v7  ;;  %s196_s2 = sshll.u32 %s305_s1, 4  ;;  %s197_s2 = int_to_ptr.vmem [resolvable:$true] %s196_s2 }
   0xf   :  { %246 = vmatprep.subr.mxu0 %v302_v1  ;;  %s280_s30 = scalar_lea.vmem %s197_s2, 16  ;;  %s284_s6 = scalar_lea.vmem %s197_s2, 32 }
  0x10   :  { %p281_p0 = scmp.ne.s32.totalorder %s197_s2, %s280_s30  ;;  %p285_p1 = scmp.lt.s32.totalorder %s197_s2, %s197_s2 }
  0x11   :  { %p286_p2 = scmp.lt.s32.totalorder %s284_s6, %s280_s30 }
  0x12   :  { %247 = vmatpush3.xpose.msk.msra.mxu0 %vm47_vm0, %v33_v8 }
  0x13   :  { %248 = vmatprep.subr.mxu0 %v302_v1  ;;  %p287_p3 = por %p286_p2, %p285_p1 }
  0x15   :  { %p288_p4 = pnand %p287_p3, %p281_p0 }
  0x16   :  { %249 = vmatpush3.xpose.msk.msra.mxu0 %vm47_vm0, %v32_v9 }
  0x17   :  { %250 = vmatprep.subr.mxu0 %v302_v1 }
  0x1a   :  { %251 = vmatpush3.xpose.msk.msra.mxu0 %vm47_vm0, %v31_v10 }
  0x1b   :  { %252 = vmatprep.subr.mxu0 %v302_v1 }
  0x1e   :  { %253 = vmatpush3.xpose.msk.msra.mxu0 %vm47_vm0, %v30_v11 }
  0x1f   :  { %254 = vmatprep.subr.mxu0 %v302_v1 }
  0x22   :  { %255 = vmatpush3.xpose.msk.msra.mxu0 %vm47_vm0, %v29_v12 }
  0x23   :  { %256 = vmatprep.subr.mxu0 %v302_v1 }
  0x26   :  { %257 = vmatpush3.xpose.msk.msra.mxu0 %vm47_vm0, %v28_v13 }
  0x27   :  { %258 = vmatprep.subr.mxu0 %v302_v1 }
  0x2a   :  { %259 = vmatpush3.xpose.msk.msra.mxu0 %vm47_vm0, %v27_v14 }
  0x2b   :  { %260 = vmatprep.subr.mxu0 %v302_v1 }
  0x2e   :  { %261 = vmatpush3.xpose.msk.msra.mxu0 %vm47_vm0, %v26_v15 }
  0x2f   :  { %262 = vmatprep.subr.mxu0 %v302_v1 }
  0x32   :  { %263 = vmatpush3.xpose.msk.msra.mxu0 %vm47_vm0, %v25_v16 }
  0x33   :  { %264 = vmatprep.subr.mxu0 %v302_v1 }
  0x36   :  { %265 = vmatpush3.xpose.msk.msra.mxu0 %vm47_vm0, %v24_v17 }
  0x37   :  { %266 = vmatprep.subr.mxu0 %v302_v1 }
  0x3a   :  { %267 = vmatpush3.xpose.msk.msra.mxu0 %vm47_vm0, %v23_v18 }
  0x3b   :  { %268 = vmatprep.subr.mxu0 %v302_v1 }
  0x3e   :  { %269 = vmatpush3.xpose.msk.msra.mxu0 %vm47_vm0, %v22_v19 }
  0x41   :  { %271 = vmatmul.mubr.msk.f32.vlgmr.msra.gmra.mxu0 %vm47_vm0, %v38_v20 }
  0x7e   :  { %v45_v21 = vpop.permute.xlu0 %44 }
  0x83   :  { %v173_v26 = vpop.permute.xlu0 %172 }
 0x101   :  { %v165_v22 = vpop.f32.mrf.mxu0 }
 0x102   :  { %v166_v23 = vadd.f32 %v165_v22, %v45_v21 }
 0x103   :  { %v272_v24 = vpop.f32.mrf.mxu0 }
 0x104   :  { %278 = vtanh.f32 %v166_v23 }
 0x111   :  { %v279_v25 = vpop.eup %278 }
 0x112   :  { %v175_v27 = vmul.f32 %v279_v25, %v173_v26 }
 0x114   :  { %v177_v28 = vsel %vm176_vm2, %v175_v27, 0.0 }
 0x115   :  { %v178_v29 = vrot.slane %v177_v28, 4 }
 0x117   :  { %v179_v30 = vadd.f32 %v178_v29, %v177_v28 }
 0x119   :  { %v180_v31 = vrot.slane %v179_v30, 2 }
 0x11b   :  { %v181_v32 = vadd.f32 %v180_v31, %v179_v30 }
 0x11d   :  { %v182_v33 = vrot.slane %v181_v32, 1 }
 0x11f   :  { %v183_v35 = vadd.f32 %v182_v33, %v181_v32 }
 0x121   :  { %v185_v36 = vadd.f32 %v184_v34, %v183_v35 }
 0x123   :  { %vm186_vm3 = vcmp.ge.f32.partialorder %v185_v36, 0.0  ;;  %v187_v37 = vmul.f32 0.01, %v185_v36 }
 0x125   :  { %v188_v38 = vsel %vm186_vm3, %v185_v36, %v187_v37 }
 0x126   :  { %189 = vst [vmem:[#allocation3] sm:$0x1] %v188_v38 }
 0x127   :  { %291 = shalt.err (!%p288_p4)
}
 0x128   :  { %199 = dma.vmem_to_hbm [thread:$0]  %s197_s2, 16, %s421_s5, [#allocation4]  }
 0x129   :  { %300 = dma.done.wait [#allocation4], 16  }
 0x12a   :  { %301 = vsyncadd [#allocation4], 4294967280 }
 0x12b   :  { %203 = vsyncpa [#allocation4], 1 }

</bundles_post_ra>
